<compile_context>
chip_gen: v7x
topology: tpu7x:2x2x1
jax: 0.10.0
libtpu: 0.0.40
codegen_flags: <defaults>
</compile_context>

<pallas_src>
import functools

import jax
import jax.numpy as jnp
from jax import lax
from jax.experimental import pallas as pl
from jax.experimental.pallas import tpu as pltpu

_LANE = 128


def _round_up(x, m):
    return ((x + m - 1) // m) * m


def _padded_tile_bytes(rows, cols, dtype):
    """VMEM bytes of a (rows, cols) tile after (sublane, lane) layout padding."""
    item = jnp.dtype(dtype).itemsize
    sublane = 32 // item            # 8 for f32, 16 for bf16, 32 for int8/fp8
    return _round_up(rows, sublane) * _round_up(cols, _LANE) * item


def _vmem_capacity_bytes():
    try:
        return int(pltpu.get_tpu_info().vmem_capacity_bytes)
    except Exception:
        return 64 << 20             # conservative fallback (v7x per-core VMEM)


def _pick_sub(bt, rank, ht_dtype):
    """Inner-loop batch sub-chunk: bounds f32 temporaries, keeps packing-aligned."""
    if bt < 32:
        return bt                   # single chunk; offset 0 is always aligned
    mat_f32 = _padded_tile_bytes(rank, rank, jnp.float32)
    ht_pack = 32 // jnp.dtype(ht_dtype).itemsize
    for cand in (32, 16, 8):
        if cand % ht_pack == 0 and cand * mat_f32 <= (2 << 20):
            return cand             # divides bt (bt is a multiple of 32 here)
    return max(8, ht_pack)          # alignment first; temps stay within headroom


def _pick_tiling(batch, rank, r_dtype, ht_dtype, *, force_bt=None,
                 target_block_bytes=8 << 20, max_tile=2048):
    """Layout-aware batch-tile / sub-chunk / vmem-limit selection."""
    batch8 = _round_up(batch, 8)
    # Physical VMEM per core (v5e/v6e: 128 MiB, v7x: 64 MiB); keep 16 MiB slack.
    budget = _vmem_capacity_bytes() - (16 << 20)

    mat_f32 = _padded_tile_bytes(rank, rank, jnp.float32)
    temp_headroom = 3 * _pick_sub(32, rank, ht_dtype) * mat_f32 + (1 << 20)

    r_row = _padded_tile_bytes(rank, rank, r_dtype)          # one padded (D,D)
    ht_row = 2 * _round_up(rank, _LANE) * jnp.dtype(ht_dtype).itemsize
    per_row = r_row + ht_row

    if force_bt is not None:
        bt = int(force_bt)
        bt = (bt // 32) * 32 if bt >= 32 else max(8, (bt // 8) * 8)
        bt = max(8, min(bt, max_tile))
        num_tiles = -(-batch8 // bt)
    else:
        bt = min(target_block_bytes // per_row,
                 max(8, (budget - temp_headroom) // (2 * per_row)),
                 max_tile, batch8)
        bt = int(bt)
        bt = (bt // 32) * 32 if bt >= 32 else max(8, (bt // 8) * 8)

        num_tiles = -(-batch8 // bt)
        # v7x megacore: a 1-tile or odd grid leaves up to half the chip's HBM
        # bandwidth idle -> prefer an even tile count (>= 2) when batch allows.
        if batch8 >= 16 and num_tiles % 2 == 1:
            bt2 = -(-batch8 // (num_tiles + 1))
            bt2 = _round_up(bt2, 32) if bt2 > 16 else _round_up(bt2, 8)
            t2 = -(-batch8 // bt2)
            if t2 % 2 == 0:
                bt, num_tiles = bt2, t2

    sub = _pick_sub(bt, rank, ht_dtype)
    blocks = bt * r_row + 2 * _padded_tile_bytes(bt, rank, ht_dtype)
    vmem_limit = int(max(16 << 20, min(budget, 2 * blocks + temp_headroom)))
    return bt, num_tiles, sub, vmem_limit


def _dura_rescal_kernel(h_ref, r_ref, t_ref, out_ref, *, sub):
    """One batch tile: stream (bt, D, D) of r in `sub`-row chunks, emit a scalar."""
    bt, rank = h_ref.shape
    n_sub = bt // sub

    def body(c, acc):
        o = pl.multiple_of(c * sub, sub)
        hc = h_ref[pl.ds(o, sub), :].astype(jnp.float32)        # (sub, D)
        tc = t_ref[pl.ds(o, sub), :].astype(jnp.float32)        # (sub, D)
        rc = r_ref[pl.ds(o, sub), :, :].astype(jnp.float32)     # (sub, D, D)
        # Fused single sweep over rc:
        #   rh[b, i] = sum_j rc[b, i, j] * hc[b, j]   == bmm(r,   h[..., None])
        #   rt[b, j] = sum_i rc[b, i, j] * tc[b, i]   == bmm(r^T, t[..., None])
        rh = jnp.sum(rc * hc[:, None, :], axis=2)
        rt = jnp.sum(rc * tc[:, :, None], axis=1)
        return acc + (hc * hc + tc * tc + rh * rh + rt * rt)

    acc = lax.fori_loop(0, n_sub, body, jnp.zeros((sub, rank), jnp.float32))
    out_ref[0, 0] = jnp.sum(acc)


def dura_rescal(h, r, t, weight, *, batch_tile=None):
    """Pallas implementation of DURA_RESCAL.forward((h, r, t))."""
    assert h.ndim == 2 and t.ndim == 2 and r.ndim == 3
    batch, rank = h.shape
    assert t.shape == (batch, rank)
    assert r.shape == (batch, rank, rank)

    bt, num_tiles, sub, vmem_limit = _pick_tiling(
        batch, rank, r.dtype, h.dtype, force_bt=batch_tile)

    batch_pad = num_tiles * bt
    if batch_pad != batch:
        pad = batch_pad - batch
        # Zero-padded rows contribute exactly 0 to every term of the norm.
        h = jnp.pad(h, ((0, pad), (0, 0)))
        t = jnp.pad(t, ((0, pad), (0, 0)))
        r = jnp.pad(r, ((0, pad), (0, 0), (0, 0)))

    # TODO(synk): for very large ranks (r block at the forced-minimum bt=8
    # exceeds the VMEM budget: rank >~ 900-1000 on v7x, ~1300-1400 on
    # v5e/v6e) add a second "arbitrary" grid axis over relation-matrix row
    # blocks with an accumulator for the r^T t term.
    # TODO(synk): if the producer can emit r lane-dense (e.g. (B, D*D) or
    # batch-minor (D, D, Bt)), restructure in_specs around that layout for
    # small/non-128-multiple D — do NOT transpose in the wrapper (extra pass).

    r_item = jnp.dtype(r.dtype).itemsize
    ht_item = jnp.dtype(h.dtype).itemsize
    cost = pl.CostEstimate(
        flops=4 * batch_pad * rank * rank + 8 * batch_pad * rank,
        transcendentals=0,
        bytes_accessed=batch_pad * rank * rank * r_item
        + 2 * batch_pad * rank * ht_item + 4 * num_tiles,
    )

    kernel = functools.partial(_dura_rescal_kernel, sub=sub)

    partials = pl.pallas_call(
        kernel,
        out_shape=jax.ShapeDtypeStruct((num_tiles, 1), jnp.float32),
        grid_spec=pltpu.PrefetchScalarGridSpec(
            num_scalar_prefetch=0,
            grid=(num_tiles,),
            in_specs=[
                pl.BlockSpec((bt, rank), lambda i: (i, 0)),
                pl.BlockSpec((bt, rank, rank), lambda i: (i, 0, 0)),
                pl.BlockSpec((bt, rank), lambda i: (i, 0)),
            ],
            out_specs=pl.BlockSpec(
                (1, 1), lambda i: (i, 0), memory_space=pltpu.SMEM
            ),
        ),
        compiler_params=pltpu.CompilerParams(
            dimension_semantics=("parallel",),   # per-tile partials -> megacore OK
            vmem_limit_bytes=vmem_limit,
        ),
        cost_estimate=cost,
    )(h, r, t)

    # Tiny final reduction + scaling in plain JAX (original batch size).
    return (jnp.float32(weight) / jnp.float32(batch)) * jnp.sum(partials)


def dura_rescal_ref(h, r, t, weight):
    """Pure-JAX reference matching the PyTorch module (f32 math, no MXU)."""
    h = h.astype(jnp.float32)
    r = r.astype(jnp.float32)
    t = t.astype(jnp.float32)
    rh = jnp.sum(r * h[:, None, :], axis=2)
    rt = jnp.sum(r * t[:, :, None], axis=1)
    norm = jnp.sum(h * h + t * t) + jnp.sum(rh * rh + rt * rt)
    return weight * norm / h.shape[0]


if __name__ == "__main__":
    key = jax.random.PRNGKey(0)
    kh, kr, kt = jax.random.split(key, 3)
    weight = 0.05

    # Small RESCAL factors: h, t (B, D); r (B, D, D).
    batch, rank = 8, 32
    h = jax.random.normal(kh, (batch, rank), dtype=jnp.float32)
    r = jax.random.normal(kr, (batch, rank, rank), dtype=jnp.float32)
    t = jax.random.normal(kt, (batch, rank), dtype=jnp.float32)

    out = jax.block_until_ready(dura_rescal(h, r, t, weight))
    ref = dura_rescal_ref(h, r, t, weight)
    assert jnp.allclose(out, ref, rtol=1e-3, atol=1e-3), (out, ref)

    # Multi-tile grid + zero-padding + bf16 r stream (the HBM-bound lever).
    batch2 = 100
    h2 = jax.random.normal(kh, (batch2, rank), dtype=jnp.float32)
    r2 = jax.random.normal(kr, (batch2, rank, rank),
                           dtype=jnp.float32).astype(jnp.bfloat16)
    t2 = jax.random.normal(kt, (batch2, rank), dtype=jnp.float32)
    out2 = jax.block_until_ready(dura_rescal(h2, r2, t2, weight))
    ref2 = dura_rescal_ref(h2, r2, t2, weight)
    assert jnp.allclose(out2, ref2, rtol=1e-3, atol=1e-2), (out2, ref2)

    print("KERNEL_OK")
</pallas_src>

<mosaic_0001>
module attributes {stable_mosaic.version = 11 : i64} {
  func.func @_dura_rescal_kernel(%arg0: i32, %arg1: memref<8x32xf32, #tpu.memory_space<vmem>>, %arg2: memref<8x32x32xf32, #tpu.memory_space<vmem>>, %arg3: memref<8x32xf32, #tpu.memory_space<vmem>>, %arg4: memref<1x1xf32, #tpu.memory_space<smem>>) attributes {dimension_semantics = [#tpu.dimension_semantics<parallel>], iteration_bounds = array<i64: 1>, scalar_prefetch = 0 : i64, scratch_operands = 0 : i64, tpu.core_type = #tpu.core_type<tc>, window_params = [{transform_indices = @transform_0, window_bounds = array<i64: 8, 32>}, {transform_indices = @transform_1, window_bounds = array<i64: 8, 32, 32>}, {transform_indices = @transform_2, window_bounds = array<i64: 8, 32>}, {transform_indices = @transform_3, window_bounds = array<i64: 1, 1>}]} {
    %cst = arith.constant 0.000000e+00 : f32
    %0 = vector.broadcast %cst : f32 to vector<8x32xf32>
    %c0_i32 = arith.constant 0 : i32
    %c8_i32 = arith.constant 8 : i32
    %1 = arith.muli %c0_i32, %c8_i32 : i32
    %2 = tpu.assume_multiple %1, 8 : i32
    %3 = arith.index_cast %2 : i32 to index
    %c0 = arith.constant 0 : index
    %4 = vector.load %arg1[%3, %c0] : memref<8x32xf32, #tpu.memory_space<vmem>>, vector<8x32xf32>
    %5 = arith.index_cast %2 : i32 to index
    %c0_0 = arith.constant 0 : index
    %6 = vector.load %arg3[%5, %c0_0] : memref<8x32xf32, #tpu.memory_space<vmem>>, vector<8x32xf32>
    %7 = arith.index_cast %2 : i32 to index
    %c0_1 = arith.constant 0 : index
    %c0_2 = arith.constant 0 : index
    %8 = vector.load %arg2[%7, %c0_1, %c0_2] : memref<8x32x32xf32, #tpu.memory_space<vmem>>, vector<8x32x32xf32>
    %9 = vector.shape_cast %4 : vector<8x32xf32> to vector<8x1x32xf32>
    %10 = vector.broadcast %9 : vector<8x1x32xf32> to vector<8x32x32xf32>
    %11 = arith.mulf %8, %10 : vector<8x32x32xf32>
    %cst_3 = arith.constant dense<0.000000e+00> : vector<8x32xf32>
    %12 = vector.multi_reduction <add>, %11, %cst_3 [2] : vector<8x32x32xf32> to vector<8x32xf32>
    %13 = vector.shape_cast %6 : vector<8x32xf32> to vector<8x32x1xf32>
    %14 = vector.broadcast %13 : vector<8x32x1xf32> to vector<8x32x32xf32>
    %15 = arith.mulf %8, %14 : vector<8x32x32xf32>
    %cst_4 = arith.constant dense<0.000000e+00> : vector<8x32xf32>
    %16 = vector.multi_reduction <add>, %15, %cst_4 [1] : vector<8x32x32xf32> to vector<8x32xf32>
    %17 = arith.mulf %4, %4 : vector<8x32xf32>
    %18 = arith.mulf %6, %6 : vector<8x32xf32>
    %19 = arith.addf %17, %18 : vector<8x32xf32>
    %20 = arith.mulf %12, %12 : vector<8x32xf32>
    %21 = arith.addf %19, %20 : vector<8x32xf32>
    %22 = arith.mulf %16, %16 : vector<8x32xf32>
    %23 = arith.addf %21, %22 : vector<8x32xf32>
    %24 = arith.addf %0, %23 : vector<8x32xf32>
    %c1_i32 = arith.constant 1 : i32
    %25 = vector.shape_cast %24 : vector<8x32xf32> to vector<1x8x32xf32>
    %cst_5 = arith.constant dense<0.000000e+00> : vector<1xf32>
    %26 = vector.multi_reduction <add>, %25, %cst_5 [1, 2] : vector<1x8x32xf32> to vector<1xf32>
    %27 = vector.shape_cast %26 : vector<1xf32> to vector<1x1x1xf32>
    %28 = vector.extract %27[0, 0, 0] : f32 from vector<1x1x1xf32>
    %c0_6 = arith.constant 0 : index
    %c0_7 = arith.constant 0 : index
    %29 = memref.load %arg4[%c0_6, %c0_7] : memref<1x1xf32, #tpu.memory_space<smem>>
    memref.store %28, %arg4[%c0_6, %c0_7] : memref<1x1xf32, #tpu.memory_space<smem>>
    return
  }
  func.func @transform_0(%arg0: i32) -> (i32, i32) {
    %c0_i32 = arith.constant 0 : i32
    %c0_i32_0 = arith.constant 0 : i32
    return %arg0, %c0_i32 : i32, i32
  }
  func.func @transform_1(%arg0: i32) -> (i32, i32, i32) {
    %c0_i32 = arith.constant 0 : i32
    %c0_i32_0 = arith.constant 0 : i32
    %c0_i32_1 = arith.constant 0 : i32
    return %arg0, %c0_i32, %c0_i32_0 : i32, i32, i32
  }
  func.func @transform_2(%arg0: i32) -> (i32, i32) {
    %c0_i32 = arith.constant 0 : i32
    %c0_i32_0 = arith.constant 0 : i32
    return %arg0, %c0_i32 : i32, i32
  }
  func.func @transform_3(%arg0: i32) -> (i32, i32) {
    %c0_i32 = arith.constant 0 : i32
    %c0_i32_0 = arith.constant 0 : i32
    return %arg0, %c0_i32 : i32, i32
  }
}

</mosaic_0001>

<bundles_post_ra>
// kernel: tpu_custom_call.1
= control target key start
LH: loop header
LB: loop body
LE: loop exit
PB: predicated region body
PF: predicated region fallthrough
CT: control target
= control target key end

     0   :  { %8 = vsyncpa [#allocation3], 0  ;;  %s1545_s0 = inlined_call_operand.hbm [shape: f32[8,32], index: 0, kind: input, shape index: {}]   ;;  %s1546_s1 = inlined_call_operand.hbm [shape: f32[8,32,32], index: 1, kind: input, shape index: {}]   ;;  %s1547_s2 = inlined_call_operand.hbm [shape: f32[8,32], index: 2, kind: input, shape index: {}]   ;;  %s1548_s3 = inlined_call_operand.hbm [shape: f32[1,1], index: 3, kind: output, shape index: {}]  }
   0x1   :  { %9 = vsyncpa [#allocation6], 0 }
   0x2   :  { %10 = vsyncpa [#allocation4], 0  ;;  %s983_s12 = smov [#allocation5]   ;;  %s901_s16 = scalar_lea.hbm %s1546_s1, 4096 }
   0x3   :  { %s26_s13 = sshll.u32 %s983_s12, 4  ;;  %p902_p0 = scmp.ne.s32.totalorder %s1546_s1, %s901_s16  ;;  %s27_s13 = int_to_ptr.vmem [resolvable:$true] %s26_s13 }
   0x4   :  { %p905_p1 = scmp.lt.u32.totalorder %s901_s16, %s1546_s1 }
   0x6   :  { %p907_p2 = pnand %p905_p1, %p902_p0 }
   0x8   :  { %910 = shalt.err (!%p907_p2)
}
   0x9   :  { %s911_s21 = scalar_lea.vmem %s27_s13, 4096  ;;  %p916_p4 = scmp.lt.s32.totalorder %s27_s13, %s27_s13 }
   0xa   :  { %p912_p3 = scmp.ne.s32.totalorder %s27_s13, %s911_s21  ;;  %p917_p5 = scmp.lt.s32.totalorder %s911_s21, %s911_s21 }
   0xc   :  { %p918_p6 = por %p917_p5, %p916_p4 }
   0xe   :  { %p919_p7 = pnand %p918_p6, %p912_p3 }
  0x10   :  { %922 = shalt.err (!%p919_p7)
}
  0x11   :  { %s984_s22 = smov 128   ;;  %s985_s23 = smov 8  }
  0x12   :  { %32 = dma.hbm_to_vmem [thread:$0]  %s1546_s1, 4096, %s27_s13, [#allocation6], %s984_s22, %s984_s22, %s985_s23  }
  0x13   :  { %s986_s26 = smov [#allocation2]   ;;  %s987_s28 = smov [#allocation7]  }
  0x14   :  { %s17_s27 = sshll.u32 %s986_s26, 4  ;;  %s39_s29 = sshll.u32 %s987_s28, 4  ;;  %s18_s27 = int_to_ptr.vmem [resolvable:$true] %s17_s27  ;;  %s40_s29 = int_to_ptr.vmem [resolvable:$true] %s39_s29 }
  0x15   :  { %s923_s5 = scalar_lea.hbm %s1545_s0, 128 }
  0x16   :  { %p924_p8 = scmp.ne.s32.totalorder %s1545_s0, %s923_s5  ;;  %p927_p9 = scmp.lt.u32.totalorder %s923_s5, %s1545_s0 }
  0x18   :  { %p929_p10 = pnand %p927_p9, %p924_p8 }
  0x1a   :  { %932 = shalt.err (!%p929_p10)
}
  0x1b   :  { %s933_s1 = scalar_lea.vmem %s18_s27, 128  ;;  %p938_p12 = scmp.lt.s32.totalorder %s18_s27, %s18_s27 }
  0x1c   :  { %p934_p11 = scmp.ne.s32.totalorder %s18_s27, %s933_s1  ;;  %p939_p13 = scmp.lt.s32.totalorder %s933_s1, %s933_s1 }
  0x1e   :  { %p940_p0 = por %p939_p13, %p938_p12 }
  0x20   :  { %p941_p1 = pnand %p940_p0, %p934_p11 }
  0x22   :  { %944 = shalt.err (!%p941_p1)
}
  0x23   :  { %20 = dma.hbm_to_vmem [thread:$0]  %s1545_s0, 128, %s18_s27, [#allocation3]  }
  0x24   :  { %s945_s14 = scalar_lea.hbm %s1547_s2, 128 }
  0x25   :  { %p946_p2 = scmp.ne.s32.totalorder %s1547_s2, %s945_s14  ;;  %p949_p3 = scmp.lt.u32.totalorder %s945_s14, %s1547_s2 }
  0x27   :  { %p951_p4 = pnand %p949_p3, %p946_p2 }
  0x29   :  { %954 = shalt.err (!%p951_p4)
}
  0x2a   :  { %s955_s19 = scalar_lea.vmem %s40_s29, 128  ;;  %p960_p6 = scmp.lt.s32.totalorder %s40_s29, %s40_s29 }
  0x2b   :  { %p956_p5 = scmp.ne.s32.totalorder %s40_s29, %s955_s19  ;;  %p961_p7 = scmp.lt.s32.totalorder %s955_s19, %s955_s19 }
  0x2d   :  { %p962_p8 = por %p961_p7, %p960_p6 }
  0x2f   :  { %p963_p9 = pnand %p962_p8, %p956_p5 }
  0x31   :  { %966 = shalt.err (!%p963_p9)
}
  0x32   :  { %42 = dma.hbm_to_vmem [thread:$0]  %s1547_s2, 128, %s40_s29, [#allocation6]  }
  0x33   :  { %977 = dma.done.wait [#allocation3], 128  }
  0x34   :  { %978 = vsyncadd [#allocation3], 4294967168 }
  0x35   :  { %979 = dma.done.wait [#allocation6], 4224  }
  0x36   :  { %980 = vsyncadd [#allocation6], 4294963072  ;;  %v93_v0 = vlaneseq  ;;  %v988_v1 = vmov 1966171168   ;;  %v1052_v6 = vld [vmem:[#allocation2] sm:$0xff]  ;;  %v1060_v11 = vld [vmem:[#allocation5] sm:$0xff] }
  0x37   :  { %v91_v2 = vunpack.c.l.s4 %v988_v1  ;;  %v1062_v12 = vld [vmem:[#allocation5 + $0x8] sm:$0xff]  ;;  %vm210_vm0 = vcmask 261120   ;;  %v1066_v15 = vld [vmem:[#allocation5 + $0x20] sm:$0xff]  ;;  %v1093_v31 = vld [vmem:[#allocation5 + $0x10] sm:$0xff]  ;;  %vm673_vm1 = vcmask 130112   ;;  %vm680_vm2 = vcmask 195712  }
  0x38   :  { %v1047_v3 = vshrl.u32 %v93_v0, 7  ;;  %v1068_v16 = vld [vmem:[#allocation5 + $0x28] sm:$0xff]  ;;  %v1079_v26 = vld [vmem:[#allocation7] sm:$0xff]  ;;  %v1106_v38 = vld [vmem:[#allocation5 + $0x30] sm:$0xff]  ;;  %v1148_v1 = vand.u32 127, %v93_v0  ;;  %vm687_vm3 = vcmask 261312  }
  0x39   :  { %v92_v4 = vunpack.c.0.s8 %v91_v2  ;;  %v1099_v34 = vld [vmem:[#allocation5 + $0x40] sm:$0xff]  ;;  %v1104_v37 = vld [vmem:[#allocation5 + $0x48] sm:$0xff]  ;;  %v1120_v46 = vld [vmem:[#allocation5 + $0x38] sm:$0xff]  ;;  %vm822_vm4 = vcmask 1041409   ;;  %vm824_vm5 = vcmask 1042434   ;;  %vm826_vm6 = vcmask 1043459  }
  0x3a   :  { %v1057_v8 = vsub.s32 0, %v1047_v3  ;;  %v328_v28 = vsub.s32 1, %v1047_v3  ;;  %v347_v44 = vsub.s32 2, %v1047_v3  ;;  %v1122_v48 = vld [vmem:[#allocation5 + $0x18] sm:$0xff]  ;;  %v1125_v50 = vld [vmem:[#allocation5 + $0x50] sm:$0xff]  ;;  %v1131_v53 = vld [vmem:[#allocation5 + $0x60] sm:$0xff] }
  0x3b   :  { %v1050_v5 = vsub.s32 %v92_v4, %v1047_v3  ;;  %v1136_v56 = vld [vmem:[#allocation5 + $0x68] sm:$0xff]  ;;  %v366_v63 = vsub.s32 3, %v1047_v3  ;;  %vm828_vm7 = vcmask 1044484   ;;  %vm830_vm8 = vcmask 1045509   ;;  %s967_s23 = scalar_lea.hbm %s1548_s3, 16 }
  0x3c   :  { %v1083_v27 = vrot.slane %v1079_v26, %v1057_v8  ;;  %v1088_v29 = vrot.slane %v1079_v26, %v328_v28  ;;  %v1116_v45 = vrot.slane %v1079_v26, %v347_v44  ;;  %vm832_vm9 = vcmask 1046534   ;;  %p968_p10 = scmp.ne.s32.totalorder %s1548_s3, %s967_s23  ;;  %p971_p11 = scmp.lt.u32.totalorder %s967_s23, %s1548_s3 }
  0x3d   :  { %v96_v7 = vrot.slane %v1052_v6, %v1050_v5  ;;  %v1152_v4 = vrot.slane %v1079_v26, %v366_v63  ;;  %vm834_vm10 = vcmask 1047559  }
  0x3e   :  { %p973_p12 = pnand %p971_p11, %p968_p10 }
  0x3f   :  { %v112_v9 = vrot.slane %v96_v7, %v1050_v5  ;;  %v104_v10 = vcombine.high %v96_v7, %v96_v7  ;;  %v1156_v7 = vsub.s32 %v1148_v1, %v1047_v3 }
  0x41   :  { %v141_v13 = vrot.slane %v112_v9, %v1057_v8  ;;  %v126_v14 = vrot.slane %v104_v10, %v1050_v5  ;;  %v134_v30 = vcombine.high %v112_v9, %v112_v9  ;;  %v668_v10 = vadd.s32 4294967288, %v1148_v1 }
  0x43   :  { %v178_v17 = vmul.f32 %v141_v13, %v1060_v11  ;;  %v145_v18 = vrot.slane %v126_v14, %v1057_v8  ;;  %v179_v19 = vmul.f32 %v141_v13, %v1062_v12  ;;  %v180_v32 = vmul.f32 %v141_v13, %v1093_v31 }
  0x44   :  { %v1097_v33 = vrot.slane %v134_v30, %v1057_v8  ;;  %v136_v47 = vcombine.high %v126_v14, %v126_v14  ;;  %v181_v51 = vmul.f32 %v141_v13, %v1122_v48 }
  0x45   :  { %v211_v20 = vsel %vm210_vm0, %v178_v17, 0.0  ;;  %v182_v21 = vmul.f32 %v145_v18, %v1066_v15  ;;  %v183_v22 = vmul.f32 %v145_v18, %v1068_v16  ;;  %v214_v24 = vsel %vm210_vm0, %v179_v19, 0.0 }
  0x46   :  { %212 = vadd.xlane.f32.xlu0 %v211_v20  ;;  %v217_v35 = vsel %vm210_vm0, %v180_v32, 0.0  ;;  %v186_v36 = vmul.f32 %v1097_v33, %v1099_v34  ;;  %v187_v40 = vmul.f32 %v1097_v33, %v1104_v37  ;;  %v184_v41 = vmul.f32 %v145_v18, %v1106_v38 }
  0x47   :  { %v223_v23 = vsel %vm210_vm0, %v182_v21, 0.0  ;;  %v226_v25 = vsel %vm210_vm0, %v183_v22, 0.0  ;;  %v185_v49 = vmul.f32 %v145_v18, %v1120_v46  ;;  %v1129_v52 = vrot.slane %v136_v47, %v1057_v8 }
  0x48   :  { %224 = vadd.xlane.f32.xlu1 %v223_v23  ;;  %v235_v39 = vsel %vm210_vm0, %v186_v36, 0.0  ;;  %v238_v42 = vsel %vm210_vm0, %v187_v40, 0.0  ;;  %v229_v43 = vsel %vm210_vm0, %v184_v41, 0.0  ;;  %v188_v55 = vmul.f32 %v1097_v33, %v1125_v50 }
  0x49   :  { %v232_v54 = vsel %vm210_vm0, %v185_v49, 0.0  ;;  %v220_v57 = vsel %vm210_vm0, %v181_v51, 0.0  ;;  %v190_v58 = vmul.f32 %v1129_v52, %v1131_v53  ;;  %v191_v60 = vmul.f32 %v1129_v52, %v1136_v56 }
  0x4a   :  { %215 = vadd.xlane.f32.xlu0 %v214_v24  ;;  %v241_v59 = vsel %vm210_vm0, %v188_v55, 0.0  ;;  %v1163_v19 = vsub.s32 %v668_v10, %v1047_v3 }
  0x4b   :  { %v247_v61 = vsel %vm210_vm0, %v190_v58, 0.0  ;;  %v250_v62 = vsel %vm210_vm0, %v191_v60, 0.0  ;;  %v1197_v58 = vld [vmem:[#allocation5 + $0x80] sm:$0xff] }
  0x4c   :  { %227 = vadd.xlane.f32.xlu1 %v226_v25 }
  0x5d   :  { %316 = vbcast.lane.b32.xlu1 %v1083_v27, 264 }
  0x60   :  { %312 = vbcast.lane.b32.xlu0 %v1083_v27, 256 }
  0x61   :  { %331 = vbcast.lane.b32.xlu1 %v1088_v29, 256 }
  0x65   :  { %335 = vbcast.lane.b32.xlu1 %v1088_v29, 264 }
  0x7f   :  { %218 = vadd.xlane.f32.xlu0 %v217_v35 }
  0x83   :  { %236 = vadd.xlane.f32.xlu0 %v235_v39 }
  0x87   :  { %239 = vadd.xlane.f32.xlu0 %v238_v42 }
  0x89   :  { %230 = vadd.xlane.f32.xlu1 %v229_v43 }
  0x9a   :  { %354 = vbcast.lane.b32.xlu1 %v1116_v45, 264 }
  0x9d   :  { %350 = vbcast.lane.b32.xlu0 %v1116_v45, 256 }
  0xbc   :  { %233 = vadd.xlane.f32.xlu0 %v232_v54 }
  0xbe   :  { %221 = vadd.xlane.f32.xlu1 %v220_v57  ;;  %v1189_v57 = vld [vmem:[#allocation5 + $0x70] sm:$0xff] }
  0xc0   :  { %242 = vadd.xlane.f32.xlu0 %v241_v59  ;;  %v1199_v59 = vld [vmem:[#allocation5 + $0x58] sm:$0xff] }
  0xc1   :  { %v189_v63 = vmul.f32 %v1097_v33, %v1199_v59  ;;  %v385_v33 = vsub.s32 4, %v1047_v3 }
  0xc2   :  { %248 = vadd.xlane.f32.xlu1 %v247_v61 }
  0xc3   :  { %v244_v10 = vsel %vm210_vm0, %v189_v63, 0.0 }
  0xc4   :  { %251 = vadd.xlane.f32.xlu0 %v250_v62  ;;  %v1204_v62 = vld [vmem:[#allocation5 + $0x88] sm:$0xff] }
  0xd3   :  { %320 = vbcast.lane.b32.xlu1 %v1083_v27, 272  ;;  %v213_v2 = vpop.xlane.xlu0 %212 }
  0xd4   :  { %v598_v9 = vmul.f32 %v213_v2, %v213_v2 }
  0xd5   :  { %v225_v13 = vpop.xlane.xlu1 %224 }
  0xd6   :  { %v667_v14 = vrot.slane %v598_v9, %v1156_v7  ;;  %v602_v17 = vmul.f32 %v225_v13, %v225_v13 }
  0xd7   :  { %369 = vbcast.lane.b32.xlu1 %v1152_v4, 256  ;;  %v216_v0 = vpop.xlane.xlu0 %215 }
  0xd8   :  { %v692_v18 = vrot.slane %v602_v17, %v1156_v7  ;;  %v599_v20 = vmul.f32 %v216_v0, %v216_v0 }
  0xd9   :  { %v228_v21 = vpop.xlane.xlu1 %227 }
  0xda   :  { %v672_v22 = vrot.slane %v599_v20, %v1163_v19  ;;  %v603_v23 = vmul.f32 %v228_v21, %v228_v21  ;;  %339 = vbcast.lane.b32.xlu0 %v1088_v29, 272 }
  0xdb   :  { %373 = vbcast.lane.b32.xlu1 %v1152_v4, 264  ;;  %v313_v24 = vpop.permute.xlu0 %312 }
  0xdc   :  { %v674_v25 = vsel %vm673_vm1, %v672_v22, %v667_v14  ;;  %v696_v28 = vrot.slane %v603_v23, %v1163_v19  ;;  %v459_v30 = vmul.f32 %v313_v24, %v1060_v11  ;;  %v89_v11 = vcombine.high %v1052_v6, %v1052_v6 }
  0xdd   :  { %v317_v32 = vpop.permute.xlu1 %316  ;;  %v675_v14 = vadd.s32 4294967280, %v1148_v1  ;;  %v1221_v22 = vrot.slane %v1079_v26, %v385_v33 }
  0xde   :  { %v697_v35 = vsel %vm673_vm1, %v696_v28, %v692_v18  ;;  %v491_v36 = vsel %vm210_vm0, %v459_v30, 0.0  ;;  %v460_v39 = vmul.f32 %v317_v32, %v1062_v12  ;;  %v103_v12 = vrot.slane %v89_v11, %v1050_v5 }
  0xdf   :  { %v1215_v17 = vsub.s32 %v675_v14, %v1047_v3 }
  0xe0   :  { %v492_v40 = vsel %vm210_vm0, %v460_v39, 0.0  ;;  %v1187_v55 = vrot.slane %v103_v12, %v1050_v5 }
  0xe1   :  { %v1175_v41 = vadd.f32 %v492_v40, %v491_v36  ;;  %v332_v42 = vpop.permute.xlu1 %331 }
  0xe2   :  { %v463_v43 = vmul.f32 %v332_v42, %v1066_v15  ;;  %v192_v15 = vmul.f32 %v1129_v52, %v1189_v57 }
  0xe4   :  { %v504_v49 = vsel %vm210_vm0, %v463_v43, 0.0  ;;  %v253_v60 = vsel %vm210_vm0, %v192_v15, 0.0 }
  0xe5   :  { %v336_v44 = vpop.permute.xlu1 %335 }
  0xe6   :  { %v464_v47 = vmul.f32 %v336_v44, %v1068_v16  ;;  %v1195_v16 = vrot.slane %v1187_v55, %v1057_v8 }
  0xe8   :  { %v505_v51 = vsel %vm210_vm0, %v464_v47, 0.0  ;;  %v194_v61 = vmul.f32 %v1195_v16, %v1197_v58  ;;  %v195_v9 = vmul.f32 %v1195_v16, %v1204_v62 }
  0xe9   :  { %v1183_v54 = vadd.f32 %v505_v51, %v504_v49 }
  0xea   :  { %v259_v2 = vsel %vm210_vm0, %v194_v61, 0.0  ;;  %v262_v13 = vsel %vm210_vm0, %v195_v9, 0.0  ;;  %v105_v61 = vcombine.high %v103_v12, %v103_v12  ;;  %v1242_v9 = vld [vmem:[#allocation5 + $0x78] sm:$0xff]  ;;  %v1254_v12 = vld [vmem:[#allocation5 + $0xa8] sm:$0xff] }
  0xec   :  { %v1238_v63 = vrot.slane %v105_v61, %v1050_v5 }
  0xf9   :  { %254 = vadd.xlane.f32.xlu0 %v253_v60 }
  0xfd   :  { %260 = vadd.xlane.f32.xlu0 %v259_v2  ;;  %v1240_v2 = vld [vmem:[#allocation5 + $0x90] sm:$0xff] }
  0xff   :  { %245 = vadd.xlane.f32.xlu1 %v244_v10  ;;  %v193_v10 = vmul.f32 %v1129_v52, %v1242_v9  ;;  %v682_v52 = vadd.s32 4294967272, %v1148_v1 }
 0x101   :  { %263 = vadd.xlane.f32.xlu0 %v262_v13  ;;  %v256_v14 = vsel %vm210_vm0, %v193_v10, 0.0 }
 0x10c   :  { %v219_v0 = vpop.xlane.xlu0 %218 }
 0x10d   :  { %v600_v18 = vmul.f32 %v219_v0, %v219_v0 }
 0x10f   :  { %v679_v20 = vrot.slane %v600_v18, %v1215_v17 }
 0x110   :  { %358 = vbcast.lane.b32.xlu1 %v1116_v45, 272  ;;  %v237_v21 = vpop.xlane.xlu0 %236 }
 0x111   :  { %v681_v23 = vsel %vm680_vm2, %v679_v20, %v674_v25  ;;  %v606_v24 = vmul.f32 %v237_v21, %v237_v21  ;;  %v1266_v20 = vsub.s32 %v682_v52, %v1047_v3 }
 0x113   :  { %v711_v28 = vrot.slane %v606_v24, %v1156_v7 }
 0x114   :  { %392 = vbcast.lane.b32.xlu1 %v1221_v22, 264  ;;  %v240_v30 = vpop.xlane.xlu0 %239 }
 0x115   :  { %v607_v32 = vmul.f32 %v240_v30, %v240_v30 }
 0x116   :  { %v231_v36 = vpop.xlane.xlu1 %230 }
 0x117   :  { %v715_v39 = vrot.slane %v607_v32, %v1163_v19  ;;  %v604_v40 = vmul.f32 %v231_v36, %v231_v36  ;;  %388 = vbcast.lane.b32.xlu0 %v1221_v22, 256  ;;  %v404_v36 = vsub.s32 5, %v1047_v3 }
 0x118   :  { %v351_v42 = vpop.permute.xlu0 %350 }
 0x119   :  { %v716_v43 = vsel %vm673_vm1, %v715_v39, %v711_v28  ;;  %v701_v44 = vrot.slane %v604_v40, %v1215_v17  ;;  %v467_v25 = vmul.f32 %v351_v42, %v1099_v34  ;;  %v196_v34 = vmul.f32 %v1195_v16, %v1240_v2 }
 0x11a   :  { %v355_v47 = vpop.permute.xlu1 %354 }
 0x11b   :  { %v702_v11 = vsel %vm680_vm2, %v701_v44, %v697_v35  ;;  %v517_v49 = vsel %vm210_vm0, %v467_v25, 0.0  ;;  %v468_v51 = vmul.f32 %v355_v47, %v1104_v37  ;;  %v1248_v35 = vrot.slane %v1238_v63, %v1057_v8  ;;  %v1250_v37 = vld [vmem:[#allocation5 + $0xa0] sm:$0xff] }
 0x11c   :  { %v265_v5 = vsel %vm210_vm0, %v196_v34, 0.0 }
 0x11d   :  { %v518_v15 = vsel %vm210_vm0, %v468_v51, 0.0  ;;  %v198_v13 = vmul.f32 %v1248_v35, %v1250_v37  ;;  %v199_v0 = vmul.f32 %v1248_v35, %v1254_v12  ;;  %v1277_v51 = vrot.slane %v1079_v26, %v404_v36 }
 0x11e   :  { %v1235_v60 = vadd.f32 %v518_v15, %v517_v49 }
 0x11f   :  { %v271_v33 = vsel %vm210_vm0, %v198_v13, 0.0  ;;  %v274_v18 = vsel %vm210_vm0, %v199_v0, 0.0 }
 0x136   :  { %266 = vadd.xlane.f32.xlu0 %v265_v5 }
 0x138   :  { %257 = vadd.xlane.f32.xlu1 %v256_v14 }
 0x13a   :  { %272 = vadd.xlane.f32.xlu0 %v271_v33 }
 0x13c   :  { %275 = vadd.xlane.f32.xlu1 %v274_v18 }
 0x149   :  { %v234_v21 = vpop.xlane.xlu0 %233 }
 0x14a   :  { %v605_v24 = vmul.f32 %v234_v21, %v234_v21 }
 0x14b   :  { %v222_v28 = vpop.xlane.xlu1 %221 }
 0x14c   :  { %v706_v30 = vrot.slane %v605_v24, %v1266_v20  ;;  %v601_v32 = vmul.f32 %v222_v28, %v222_v28 }
 0x14d   :  { %v243_v39 = vpop.xlane.xlu0 %242  ;;  %343 = vbcast.lane.b32.xlu1 %v1088_v29, 280 }
 0x14e   :  { %v707_v40 = vsel %vm687_vm3, %v706_v30, %v702_v11  ;;  %v686_v1 = vrot.slane %v601_v32, %v1266_v20  ;;  %v608_v42 = vmul.f32 %v243_v39, %v243_v39 }
 0x14f   :  { %v249_v44 = vpop.xlane.xlu1 %248 }
 0x150   :  { %v688_v25 = vsel %vm687_vm3, %v686_v1, %v681_v23  ;;  %v720_v47 = vrot.slane %v608_v42, %v1215_v17  ;;  %v610_v49 = vmul.f32 %v249_v44, %v249_v44  ;;  %324 = vbcast.lane.b32.xlu0 %v1083_v27, 280  ;;  %v1321_v1 = vld [vmem:[#allocation5 + $0xc8] sm:$0xff] }
 0x151   :  { %v1280_v15 = vsel %vm822_vm4, %v707_v40, %v688_v25  ;;  %v252_v29 = vpop.xlane.xlu0 %251  ;;  %377 = vbcast.lane.b32.xlu1 %v1152_v4, 272 }
 0x152   :  { %v721_v11 = vsel %vm680_vm2, %v720_v47, %v716_v43  ;;  %v730_v61 = vrot.slane %v610_v49, %v1156_v7  ;;  %v611_v34 = vmul.f32 %v252_v29, %v252_v29  ;;  %v423_v29 = vsub.s32 6, %v1047_v3 }
 0x153   :  { %v321_v23 = vpop.permute.xlu1 %320 }
 0x154   :  { %v734_v10 = vrot.slane %v611_v34, %v1163_v19  ;;  %v461_v5 = vmul.f32 %v321_v23, %v1093_v31  ;;  %411 = vbcast.lane.b32.xlu0 %v1277_v51, 264  ;;  %v1334_v23 = vrot.slane %v1079_v26, %v423_v29 }
 0x155   :  { %v340_v27 = vpop.permute.xlu0 %339  ;;  %407 = vbcast.lane.b32.xlu1 %v1277_v51, 256 }
 0x156   :  { %v735_v13 = vsel %vm673_vm1, %v734_v10, %v730_v61  ;;  %v494_v14 = vsel %vm210_vm0, %v461_v5, 0.0  ;;  %v465_v0 = vmul.f32 %v340_v27, %v1106_v38  ;;  %v135_v38 = vcombine.high %v1187_v55, %v1187_v55 }
 0x157   :  { %v1293_v43 = vadd.f32 %v494_v14, %v1175_v41  ;;  %v370_v33 = vpop.permute.xlu1 %369  ;;  %v1307_v41 = vld [vmem:[#allocation5 + $0xb0] sm:$0xff] }
 0x158   :  { %v507_v18 = vsel %vm210_vm0, %v465_v0, 0.0  ;;  %v471_v31 = vmul.f32 %v370_v33, %v1131_v53  ;;  %v1312_v36 = vrot.slane %v135_v38, %v1057_v8  ;;  %v1314_v53 = vld [vmem:[#allocation5 + $0xc0] sm:$0xff] }
 0x159   :  { %v1297_v52 = vadd.f32 %v507_v18, %v1183_v54  ;;  %v200_v54 = vmul.f32 %v1248_v35, %v1307_v41 }
 0x15a   :  { %v530_v28 = vsel %vm210_vm0, %v471_v31, 0.0  ;;  %v202_v40 = vmul.f32 %v1312_v36, %v1314_v53  ;;  %v203_v44 = vmul.f32 %v1312_v36, %v1321_v1 }
 0x15b   :  { %v374_v21 = vpop.permute.xlu1 %373  ;;  %v277_v39 = vsel %vm210_vm0, %v200_v54, 0.0  ;;  %v1356_v54 = vld [vmem:[#allocation5 + $0xe0] sm:$0xff] }
 0x15c   :  { %v472_v24 = vmul.f32 %v374_v21, %v1136_v56  ;;  %v1316_v56 = vld [vmem:[#allocation5 + $0x98] sm:$0xff]  ;;  %v283_v42 = vsel %vm210_vm0, %v202_v40, 0.0  ;;  %v286_v47 = vsel %vm210_vm0, %v203_v44, 0.0 }
 0x15d   :  { %v197_v55 = vmul.f32 %v1195_v16, %v1316_v56 }
 0x15e   :  { %v531_v30 = vsel %vm210_vm0, %v472_v24, 0.0 }
 0x15f   :  { %v1303_v32 = vadd.f32 %v531_v30, %v530_v28  ;;  %v268_v25 = vsel %vm210_vm0, %v197_v55, 0.0  ;;  %v137_v28 = vcombine.high %v1238_v63, %v1238_v63  ;;  %v1349_v30 = vld [vmem:[#allocation5 + $0xd0] sm:$0xff]  ;;  %v1363_v55 = vld [vmem:[#allocation5 + $0xe8] sm:$0xff] }
 0x160   :  { %v204_v38 = vmul.f32 %v1312_v36, %v1349_v30 }
 0x173   :  { %278 = vadd.xlane.f32.xlu0 %v277_v39  ;;  %v1358_v39 = vld [vmem:[#allocation5 + $0xb8] sm:$0xff] }
 0x174   :  { %v201_v63 = vmul.f32 %v1248_v35, %v1358_v39 }
 0x176   :  { %v280_v44 = vsel %vm210_vm0, %v201_v63, 0.0 }
 0x177   :  { %284 = vadd.xlane.f32.xlu0 %v283_v42 }
 0x179   :  { %269 = vadd.xlane.f32.xlu1 %v268_v25 }
 0x17b   :  { %287 = vadd.xlane.f32.xlu0 %v286_v47 }
 0x186   :  { %v255_v49 = vpop.xlane.xlu0 %254 }
 0x187   :  { %v612_v61 = vmul.f32 %v255_v49, %v255_v49 }
 0x189   :  { %v739_v34 = vrot.slane %v612_v61, %v1215_v17  ;;  %v442_v61 = vsub.s32 7, %v1047_v3 }
 0x18a   :  { %362 = vbcast.lane.b32.xlu1 %v1116_v45, 280  ;;  %v261_v16 = vpop.xlane.xlu0 %260 }
 0x18b   :  { %v740_v10 = vsel %vm680_vm2, %v739_v34, %v735_v13  ;;  %v614_v5 = vmul.f32 %v261_v16, %v261_v16 }
 0x18c   :  { %v246_v27 = vpop.xlane.xlu1 %245 }
 0x18d   :  { %v609_v14 = vmul.f32 %v246_v27, %v246_v27  ;;  %v749_v0 = vrot.slane %v614_v5, %v1156_v7 }
 0x18e   :  { %426 = vbcast.lane.b32.xlu1 %v1334_v23, 256  ;;  %v264_v33 = vpop.xlane.xlu0 %263 }
 0x18f   :  { %v725_v18 = vrot.slane %v609_v14, %v1266_v20  ;;  %v615_v31 = vmul.f32 %v264_v33, %v264_v33 }
 0x190   :  { %v1372_v47 = vpop.permute.xlu1 %358 }
 0x191   :  { %v726_v45 = vsel %vm687_vm3, %v725_v18, %v721_v11  ;;  %v753_v21 = vrot.slane %v615_v31, %v1163_v19  ;;  %396 = vbcast.lane.b32.xlu0 %v1221_v22, 272  ;;  %v1354_v11 = vrot.slane %v137_v28, %v1057_v8 }
 0x192   :  { %v825_v13 = vsel %vm824_vm5, %v726_v45, %v1280_v15  ;;  %430 = vbcast.lane.b32.xlu1 %v1334_v23, 264  ;;  %v289_v15 = vsel %vm210_vm0, %v204_v38, 0.0  ;;  %v1374_v49 = vpop.permute.xlu0 %388 }
 0x193   :  { %v754_v24 = vsel %vm673_vm1, %v753_v21, %v749_v0  ;;  %v206_v40 = vmul.f32 %v1354_v11, %v1356_v54  ;;  %v207_v8 = vmul.f32 %v1354_v11, %v1363_v55  ;;  %v1382_v0 = vrot.slane %v1079_v26, %v442_v61 }
 0x194   :  { %v1376_v29 = vpop.permute.xlu1 %392 }
 0x195   :  { %v295_v42 = vsel %vm210_vm0, %v206_v40, 0.0  ;;  %v298_v25 = vsel %vm210_vm0, %v207_v8, 0.0 }
 0x1b0   :  { %290 = vadd.xlane.f32.xlu0 %v289_v15 }
 0x1b4   :  { %296 = vadd.xlane.f32.xlu0 %v295_v42 }
 0x1b6   :  { %281 = vadd.xlane.f32.xlu1 %v280_v44 }
 0x1b8   :  { %299 = vadd.xlane.f32.xlu0 %v298_v25 }
 0x1c3   :  { %v267_v35 = vpop.xlane.xlu0 %266 }
 0x1c4   :  { %v616_v34 = vmul.f32 %v267_v35, %v267_v35 }
 0x1c5   :  { %v258_v16 = vpop.xlane.xlu1 %257 }
 0x1c6   :  { %v758_v5 = vrot.slane %v616_v34, %v1215_v17  ;;  %v613_v27 = vmul.f32 %v258_v16, %v258_v16 }
 0x1c7   :  { %381 = vbcast.lane.b32.xlu1 %v1152_v4, 280  ;;  %v273_v14 = vpop.xlane.xlu0 %272 }
 0x1c8   :  { %v1385_v33 = vsel %vm680_vm2, %v758_v5, %v754_v24  ;;  %v744_v18 = vrot.slane %v613_v27, %v1266_v20  ;;  %v618_v31 = vmul.f32 %v273_v14, %v273_v14 }
 0x1c9   :  { %v276_v45 = vpop.xlane.xlu1 %275 }
 0x1ca   :  { %v745_v3 = vsel %vm687_vm3, %v744_v18, %v740_v10  ;;  %v768_v21 = vrot.slane %v618_v31, %v1156_v7  ;;  %v619_v28 = vmul.f32 %v276_v45, %v276_v45 }
 0x1cb   :  { %v827_v38 = vsel %vm826_vm6, %v745_v3, %v825_v13  ;;  %445 = vbcast.lane.b32.xlu1 %v1382_v0, 256  ;;  %v325_v4 = vpop.permute.xlu0 %324 }
 0x1cc   :  { %v772_v15 = vrot.slane %v619_v28, %v1163_v19  ;;  %v462_v24 = vmul.f32 %v325_v4, %v1122_v48  ;;  %v1407_v28 = vld [vmem:[#allocation5 + $0xd8] sm:$0xff] }
 0x1cd   :  { %v344_v40 = vpop.permute.xlu1 %343 }
 0x1ce   :  { %v773_v63 = vsel %vm673_vm1, %v772_v15, %v768_v21  ;;  %v496_v42 = vsel %vm210_vm0, %v462_v24, 0.0  ;;  %v466_v8 = vmul.f32 %v344_v40, %v1120_v46  ;;  %415 = vbcast.lane.b32.xlu0 %v1277_v51, 272  ;;  %v1403_v21 = vld [vmem:[#allocation5 + $0xf0] sm:$0xff]  ;;  %v205_v15 = vmul.f32 %v1312_v36, %v1407_v28 }
 0x1cf   :  { %v497_v10 = vadd.f32 %v496_v42, %v1293_v43  ;;  %449 = vbcast.lane.b32.xlu1 %v1382_v0, 264  ;;  %v1413_v42 = vpop.permute.xlu0 %411  ;;  %v469_v36 = vmul.f32 %v1372_v47, %v1125_v50 }
 0x1d0   :  { %v509_v13 = vsel %vm210_vm0, %v466_v8, 0.0  ;;  %v292_v24 = vsel %vm210_vm0, %v205_v15, 0.0 }
 0x1d1   :  { %v498_v44 = vrot.slane %v497_v10, 4  ;;  %v510_v25 = vadd.f32 %v509_v13, %v1297_v52  ;;  %v208_v52 = vmul.f32 %v1354_v11, %v1403_v21  ;;  %v378_v40 = vpop.permute.xlu1 %377 }
 0x1d3   :  { %v499_v35 = vadd.f32 %v498_v44, %v497_v10  ;;  %v511_v48 = vrot.slane %v510_v25, 4  ;;  %v301_v4 = vsel %vm210_vm0, %v208_v52, 0.0 }
 0x1d5   :  { %v500_v61 = vrot.slane %v499_v35, 2  ;;  %v512_v34 = vadd.f32 %v511_v48, %v510_v25  ;;  %v1415_v13 = vpop.permute.xlu1 %407 }
 0x1d7   :  { %v501_v16 = vadd.f32 %v500_v61, %v499_v35  ;;  %v513_v5 = vrot.slane %v512_v34, 2  ;;  %v520_v61 = vsel %vm210_vm0, %v469_v36, 0.0 }
 0x1d8   :  { %v521_v50 = vadd.f32 %v520_v61, %v1235_v60 }
 0x1d9   :  { %v502_v27 = vrot.slane %v501_v16, 1  ;;  %v514_v14 = vadd.f32 %v513_v5, %v512_v34 }
 0x1db   :  { %v503_v46 = vadd.f32 %v502_v27, %v501_v16  ;;  %v515_v18 = vrot.slane %v514_v14, 1 }
 0x1dd   :  { %v516_v31 = vadd.f32 %v515_v18, %v514_v14  ;;  %v838_v45 = vmul.f32 %v503_v46, %v503_v46 }
 0x1df   :  { %v839_v43 = vmul.f32 %v516_v31, %v516_v31 }
 0x1e1   :  { %v854_v3 = vsel %vm822_vm4, %v839_v43, %v838_v45  ;;  %v1436_v43 = vld [vmem:[#allocation5 + $0xf8] sm:$0xff] }
 0x1e2   :  { %v209_v60 = vmul.f32 %v1354_v11, %v1436_v43 }
 0x1ed   :  { %302 = vadd.xlane.f32.xlu0 %v301_v4 }
 0x1f3   :  { %293 = vadd.xlane.f32.xlu1 %v292_v24 }
 0x200   :  { %v279_v8 = vpop.xlane.xlu0 %278 }
 0x201   :  { %v620_v10 = vmul.f32 %v279_v8, %v279_v8 }
 0x203   :  { %v777_v44 = vrot.slane %v620_v10, %v1215_v17  ;;  %400 = vbcast.lane.b32.xlu0 %v1221_v22, 280 }
 0x204   :  { %434 = vbcast.lane.b32.xlu1 %v1334_v23, 272 }
 0x205   :  { %v778_v25 = vsel %vm680_vm2, %v777_v44, %v773_v63 }
 0x206   :  { %v270_v35 = vpop.xlane.xlu1 %269 }
 0x207   :  { %v617_v48 = vmul.f32 %v270_v35, %v270_v35  ;;  %419 = vbcast.lane.b32.xlu0 %v1277_v51, 280 }
 0x209   :  { %v763_v34 = vrot.slane %v617_v48, %v1266_v20 }
 0x20a   :  { %v363_v16 = vpop.permute.xlu1 %362 }
 0x20b   :  { %v764_v22 = vsel %vm687_vm3, %v763_v34, %v1385_v33  ;;  %v470_v5 = vmul.f32 %v363_v16, %v1199_v59  ;;  %453 = vbcast.lane.b32.xlu0 %v1382_v0, 272  ;;  %v285_v16 = vpop.xlane.xlu0 %284 }
 0x20c   :  { %v829_v47 = vsel %vm828_vm7, %v764_v22, %v827_v38  ;;  %v304_v38 = vsel %vm210_vm0, %v209_v60, 0.0  ;;  %v622_v60 = vmul.f32 %v285_v16, %v285_v16 }
 0x20d   :  { %v522_v63 = vsel %vm210_vm0, %v470_v5, 0.0 }
 0x20e   :  { %v523_v51 = vadd.f32 %v522_v63, %v521_v50 }
 0x20f   :  { %438 = vbcast.lane.b32.xlu0 %v1334_v23, 280  ;;  %v1441_v23 = vpop.permute.xlu1 %426  ;;  %v288_v63 = vpop.xlane.xlu0 %287 }
 0x210   :  { %v524_v27 = vrot.slane %v523_v51, 4 }
 0x212   :  { %v525_v14 = vadd.f32 %v524_v27, %v523_v51 }
 0x213   :  { %457 = vbcast.lane.b32.xlu0 %v1382_v0, 280  ;;  %v1443_v52 = vpop.permute.xlu1 %430  ;;  %v473_v0 = vmul.f32 %v378_v40, %v1189_v57  ;;  %v397_v51 = vpop.permute.xlu0 %396 }
 0x214   :  { %v526_v46 = vrot.slane %v525_v14, 2 }
 0x215   :  { %v533_v24 = vsel %vm210_vm0, %v473_v0, 0.0 }
 0x216   :  { %v527_v18 = vadd.f32 %v526_v46, %v525_v14  ;;  %v534_v44 = vadd.f32 %v533_v24, %v1303_v32  ;;  %v476_v46 = vmul.f32 %v1376_v29, %v1204_v62  ;;  %v787_v62 = vrot.slane %v622_v60, %v1156_v7 }
 0x218   :  { %v528_v33 = vrot.slane %v527_v18, 1 }
 0x21a   :  { %v529_v31 = vadd.f32 %v528_v33, %v527_v18  ;;  %v475_v18 = vmul.f32 %v1374_v49, %v1197_v58  ;;  %v477_v33 = vmul.f32 %v397_v51, %v1240_v2 }
 0x21c   :  { %v840_v59 = vmul.f32 %v529_v31, %v529_v31 }
 0x21e   :  { %v855_v45 = vsel %vm824_vm5, %v840_v59, %v854_v3  ;;  %v544_v59 = vsel %vm210_vm0, %v476_v46, 0.0  ;;  %v480_v46 = vmul.f32 %v1413_v42, %v1254_v12  ;;  %v483_v12 = vmul.f32 %v1441_v23, %v1314_v53 }
 0x220   :  { %v569_v23 = vsel %vm210_vm0, %v483_v12, 0.0 }
 0x228   :  { %305 = vadd.xlane.f32.xlu1 %v304_v38  ;;  %v623_v38 = vmul.f32 %v288_v63, %v288_v63 }
 0x22a   :  { %v791_v58 = vrot.slane %v623_v38, %v1163_v19 }
 0x243   :  { %v282_v4 = vpop.xlane.xlu1 %281 }
 0x244   :  { %v621_v15 = vmul.f32 %v282_v4, %v282_v4 }
 0x246   :  { %v782_v3 = vrot.slane %v621_v15, %v1266_v20  ;;  %v546_v15 = vsel %vm210_vm0, %v477_v33, 0.0 }
 0x247   :  { %v382_v8 = vpop.permute.xlu1 %381 }
 0x248   :  { %v783_v10 = vsel %vm687_vm3, %v782_v3, %v778_v25  ;;  %v474_v11 = vmul.f32 %v382_v8, %v1242_v9  ;;  %v291_v9 = vpop.xlane.xlu0 %290 }
 0x249   :  { %v831_v36 = vsel %vm830_vm8, %v783_v10, %v829_v47  ;;  %v624_v0 = vmul.f32 %v291_v9, %v291_v9 }
 0x24a   :  { %v535_v35 = vsel %vm210_vm0, %v474_v11, 0.0 }
 0x24b   :  { %v536_v48 = vadd.f32 %v535_v35, %v534_v44  ;;  %v446_v14 = vpop.permute.xlu1 %445  ;;  %v796_v29 = vrot.slane %v624_v0, %v1215_v17  ;;  %v557_v0 = vsel %vm210_vm0, %v480_v46, 0.0 }
 0x24c   :  { %v1454_v27 = vpop.xlane.xlu0 %296 }
 0x24d   :  { %v537_v57 = vrot.slane %v536_v48, 4 }
 0x24f   :  { %v538_v40 = vadd.f32 %v537_v57, %v536_v48  ;;  %v450_v4 = vpop.permute.xlu1 %449  ;;  %v792_v48 = vsel %vm673_vm1, %v791_v58, %v787_v62 }
 0x250   :  { %v1456_v32 = vpop.xlane.xlu0 %299  ;;  %v488_v60 = vmul.f32 %v450_v4, %v1363_v55 }
 0x251   :  { %v539_v61 = vrot.slane %v538_v40, 2 }
 0x253   :  { %v540_v34 = vadd.f32 %v539_v61, %v538_v40  ;;  %v797_v40 = vsel %vm680_vm2, %v796_v29, %v792_v48 }
 0x254   :  { %v416_v47 = vpop.permute.xlu0 %415 }
 0x255   :  { %v541_v22 = vrot.slane %v540_v34, 1 }
 0x257   :  { %v542_v5 = vadd.f32 %v541_v22, %v540_v34 }
 0x259   :  { %v841_v50 = vmul.f32 %v542_v5, %v542_v5 }
 0x25b   :  { %v856_v25 = vsel %vm826_vm6, %v841_v50, %v855_v45  ;;  %v543_v45 = vsel %vm210_vm0, %v475_v18, 0.0  ;;  %v479_v18 = vmul.f32 %v1415_v13, %v1250_v37 }
 0x25c   :  { %v545_v24 = vadd.f32 %v544_v59, %v543_v45  ;;  %v484_v45 = vmul.f32 %v1443_v52, %v1321_v1 }
 0x25d   :  { %v556_v13 = vsel %vm210_vm0, %v479_v18, 0.0 }
 0x25e   :  { %v547_v49 = vadd.f32 %v546_v15, %v545_v24  ;;  %v487_v15 = vmul.f32 %v446_v14, %v1356_v54  ;;  %v570_v55 = vsel %vm210_vm0, %v484_v45, 0.0 }
 0x25f   :  { %v571_v54 = vadd.f32 %v570_v55, %v569_v23 }
 0x27a   :  { %v1463_v31 = vpop.xlane.xlu0 %302 }
 0x27e   :  { %v401_v3 = vpop.permute.xlu0 %400 }
 0x27f   :  { %v478_v2 = vmul.f32 %v401_v3, %v1316_v56 }
 0x280   :  { %v294_v8 = vpop.xlane.xlu1 %293 }
 0x281   :  { %v548_v10 = vsel %vm210_vm0, %v478_v2, 0.0  ;;  %v625_v11 = vmul.f32 %v294_v8, %v294_v8 }
 0x282   :  { %v549_v44 = vadd.f32 %v548_v10, %v547_v49  ;;  %v420_v35 = vpop.permute.xlu0 %419 }
 0x283   :  { %v801_v57 = vrot.slane %v625_v11, %v1266_v20  ;;  %v482_v1 = vmul.f32 %v420_v35, %v1358_v39  ;;  %v582_v39 = vsel %vm210_vm0, %v487_v15, 0.0 }
 0x284   :  { %v550_v61 = vrot.slane %v549_v44, 4  ;;  %v435_v59 = vpop.permute.xlu1 %434 }
 0x285   :  { %v802_v34 = vsel %vm687_vm3, %v801_v57, %v797_v40  ;;  %v485_v42 = vmul.f32 %v435_v59, %v1349_v30  ;;  %v558_v30 = vadd.f32 %v557_v0, %v556_v13 }
 0x286   :  { %v551_v56 = vadd.f32 %v550_v61, %v549_v44  ;;  %v1478_v16 = vsel %vm832_vm9, %v802_v34, %v831_v36  ;;  %v454_v22 = vpop.permute.xlu0 %453  ;;  %v481_v36 = vmul.f32 %v416_v47, %v1307_v41  ;;  %v583_v47 = vsel %vm210_vm0, %v488_v60, 0.0 }
 0x287   :  { %v489_v41 = vmul.f32 %v454_v22, %v1403_v21  ;;  %v572_v4 = vsel %vm210_vm0, %v485_v42, 0.0  ;;  %v561_v21 = vsel %vm210_vm0, %v482_v1, 0.0 }
 0x288   :  { %v552_v5 = vrot.slane %v551_v56, 2  ;;  %v573_v62 = vadd.f32 %v572_v4, %v571_v54 }
 0x289   :  { %v585_v14 = vsel %vm210_vm0, %v489_v41, 0.0 }
 0x28a   :  { %v553_v50 = vadd.f32 %v552_v5, %v551_v56  ;;  %v439_v51 = vpop.permute.xlu0 %438 }
 0x28b   :  { %v486_v52 = vmul.f32 %v439_v51, %v1407_v28  ;;  %v584_v28 = vadd.f32 %v583_v47, %v582_v39 }
 0x28c   :  { %v554_v63 = vrot.slane %v553_v50, 1 }
 0x28d   :  { %v574_v3 = vsel %vm210_vm0, %v486_v52, 0.0  ;;  %v586_v2 = vadd.f32 %v585_v14, %v584_v28 }
 0x28e   :  { %v555_v9 = vadd.f32 %v554_v63, %v553_v50  ;;  %v458_v37 = vpop.permute.xlu0 %457  ;;  %v575_v49 = vadd.f32 %v574_v3, %v573_v62  ;;  %v626_v50 = vmul.f32 %v1454_v27, %v1454_v27  ;;  %v627_v63 = vmul.f32 %v1456_v32, %v1456_v32 }
 0x28f   :  { %v490_v53 = vmul.f32 %v458_v37, %v1436_v43  ;;  %v596_v27 = vmul.f32 %v1079_v26, %v1079_v26 }
 0x290   :  { %v842_v33 = vmul.f32 %v555_v9, %v555_v9  ;;  %v576_v10 = vrot.slane %v575_v49, 4  ;;  %v628_v9 = vmul.f32 %v1463_v31, %v1463_v31  ;;  %v806_v59 = vrot.slane %v626_v50, %v1156_v7 }
 0x291   :  { %v587_v58 = vsel %vm210_vm0, %v490_v53, 0.0  ;;  %v810_v45 = vrot.slane %v627_v63, %v1163_v19 }
 0x292   :  { %v1489_v38 = vsel %vm828_vm7, %v842_v33, %v856_v25  ;;  %v559_v25 = vsel %vm210_vm0, %v481_v36, 0.0  ;;  %v588_v29 = vadd.f32 %v587_v58, %v586_v2  ;;  %v577_v35 = vadd.f32 %v576_v10, %v575_v49 }
 0x293   :  { %v560_v24 = vadd.f32 %v559_v25, %v558_v30  ;;  %v595_v33 = vmul.f32 %v1052_v6, %v1052_v6  ;;  %v815_v60 = vrot.slane %v628_v9, %v1215_v17  ;;  %v811_v31 = vsel %vm673_vm1, %v810_v45, %v806_v59 }
 0x294   :  { %v589_v11 = vrot.slane %v588_v29, 4  ;;  %v578_v40 = vrot.slane %v577_v35, 2 }
 0x295   :  { %v562_v43 = vadd.f32 %v561_v21, %v560_v24  ;;  %v597_v6 = vadd.f32 %v596_v27, %v595_v33  ;;  %v816_v7 = vsel %vm680_vm2, %v815_v60, %v811_v31 }
 0x296   :  { %v590_v48 = vadd.f32 %v589_v11, %v588_v29  ;;  %v579_v56 = vadd.f32 %v578_v40, %v577_v35 }
 0x297   :  { %v563_v8 = vrot.slane %v562_v43, 4 }
 0x298   :  { %v591_v61 = vrot.slane %v590_v48, 2  ;;  %v580_v51 = vrot.slane %v579_v56, 1 }
 0x299   :  { %v564_v44 = vadd.f32 %v563_v8, %v562_v43 }
 0x29a   :  { %v592_v22 = vadd.f32 %v591_v61, %v590_v48  ;;  %v581_v36 = vadd.f32 %v580_v51, %v579_v56 }
 0x29b   :  { %v565_v57 = vrot.slane %v564_v44, 2 }
 0x29c   :  { %v593_v46 = vrot.slane %v592_v22, 1  ;;  %v844_v37 = vmul.f32 %v581_v36, %v581_v36 }
 0x29d   :  { %v566_v34 = vadd.f32 %v565_v57, %v564_v44 }
 0x29e   :  { %v594_v0 = vadd.f32 %v593_v46, %v592_v22 }
 0x29f   :  { %v567_v5 = vrot.slane %v566_v34, 1 }
 0x2a0   :  { %v845_v15 = vmul.f32 %v594_v0, %v594_v0 }
 0x2a1   :  { %v568_v18 = vadd.f32 %v567_v5, %v566_v34 }
 0x2a3   :  { %v843_v42 = vmul.f32 %v568_v18, %v568_v18 }
 0x2a5   :  { %v858_v17 = vsel %vm830_vm8, %v843_v42, %v1489_v38 }
 0x2a6   :  { %v859_v41 = vsel %vm832_vm9, %v844_v37, %v858_v17 }
 0x2a7   :  { %v860_v55 = vsel %vm834_vm10, %v845_v15, %v859_v41 }
 0x2b5   :  { %v306_v32 = vpop.xlane.xlu1 %305 }
 0x2b6   :  { %v629_v12 = vmul.f32 %v306_v32, %v306_v32 }
 0x2b8   :  { %v820_v13 = vrot.slane %v629_v12, %v1266_v20 }
 0x2ba   :  { %v821_v19 = vsel %vm687_vm3, %v820_v13, %v816_v7 }
 0x2bb   :  { %v835_v26 = vsel %vm834_vm10, %v821_v19, %v1478_v16 }
 0x2bc   :  { %v837_v1 = vadd.f32 %v835_v26, %v597_v6 }
 0x2be   :  { %v862_v52 = vadd.f32 %v860_v55, %v837_v1 }
 0x2c0   :  { %v864_v25 = vsel %vm210_vm0, %v862_v52, 0.0 }
 0x2c1   :  { %865 = vadd.xlane.f32.xlu0 %v864_v25 }
 0x34e   :  { %v866_v20 = vpop.xlane.xlu0 %865 }
 0x34f   :  { %v867_v47 = vrot.slane %v866_v20, 4 }
 0x351   :  { %v868_v53 = vadd.f32 %v867_v47, %v866_v20 }
 0x353   :  { %v869_v30 = vrot.slane %v868_v53, 2 }
 0x355   :  { %v870_v23 = vadd.f32 %v869_v30, %v868_v53 }
 0x357   :  { %v871_v4 = vrot.slane %v870_v23, 1 }
 0x359   :  { %v872_v54 = vadd.f32 %v871_v4, %v870_v23 }
 0x35b   :  { %891 = vpush %v872_v54 }
 0x38c   :  { %s892_s2 = spop %891 }
 0x38d   :  { %875 = sst [smem:[#allocation8]] %s892_s2 }
 0x38e   :  { %976 = shalt.err (!%p973_p12)
}
 0x38f   :  { %s989_s28 = smov [#allocation8]  }
 0x390   :  { %883 = dma.smem_to_hbm %s989_s28, 16, %s1548_s3, [#allocation4]  }
 0x391   :  { %981 = dma.done.wait [#allocation4], 16  }
 0x392   :  { %982 = vsyncadd [#allocation4], 4294967280 }
 0x393   :  { %887 = sfence }
 0x394   :  { %888 = vsyncpa [#allocation3], 1 }
 0x395   :  { %889 = vsyncpa [#allocation6], 1 }
 0x396   :  { %890 = vsyncpa [#allocation4], 1 }

</bundles_post_ra>
